<compile_context>
chip_gen: v7x
topology: tpu7x:2x2x1
jax: 0.10.0
libtpu: 0.0.40
codegen_flags: <defaults>
</compile_context>

<pallas_src>
import jax
import jax.numpy as jnp
from jax.experimental import pallas as pl
from jax.experimental.pallas import tpu as pltpu


def _make_dice_kernel(hw, tile_hw, ragged):
    def kernel(out_ref, tgt_ref, inter_ref, tsum_ref):
        j = pl.program_id(1)

        @pl.when(j == 0)
        def _():
            inter_ref[...] = jnp.zeros_like(inter_ref)
            tsum_ref[...] = jnp.zeros_like(tsum_ref)

        x = out_ref[0].astype(jnp.float32)   # (C, tile_hw) logits
        t = tgt_ref[0].astype(jnp.float32)   # (C, tile_hw) target probs

        if ragged:
            lane = jax.lax.broadcasted_iota(jnp.int32, (1, tile_hw), 1)
            valid = (j * tile_hw + lane) < hw          # (1, tile_hw)
            x = jnp.where(valid, x, 0.0)               # safe softmax on padded lanes
            t = jnp.where(valid, t, 0.0)               # padded lanes contribute 0

        # softmax over the channel axis, without materializing p = e / s.
        m = jnp.max(x, axis=0, keepdims=True)          # (1, tile_hw)
        e = jnp.exp(x - m)                             # (C, tile_hw)
        s = jnp.sum(e, axis=0, keepdims=True)          # (1, tile_hw)  sum_c e
        num = jnp.sum(e * t, axis=0, keepdims=True)    # (1, tile_hw)  sum_c e*t

        # per-pixel sum_c softmax_c * t_c  and  sum_c t_c ; pure lane-wise adds
        # into the per-batch output accumulators (resident across the j axis).
        inter_ref[...] += (num / s).reshape(1, 1, tile_hw)
        tsum_ref[...] += jnp.sum(t, axis=0, keepdims=True).reshape(1, 1, tile_hw)

    return kernel


def _pick_tile(hw, c, itemsize, max_tile=32768, vmem_budget=8 << 20):
    """Choose a lane tile size that fits comfortably in v5e's 16 MiB scoped VMEM."""
    # 2 inputs x 2 pipeline buffers x C x itemsize + 2 f32 output accumulators x 2.
    per_lane = 2 * 2 * c * itemsize + 2 * 2 * 4
    cap = max(128, min(max_tile, (vmem_budget // per_lane) // 128 * 128))
    if hw <= cap:
        return hw, 1, False                 # full H*W in one block (any alignment)
    return cap, pl.cdiv(hw, cap), (hw % cap != 0)


def dice_loss(output, target, *, max_tile=32768):
    """Pallas implementation of DiceLoss.forward (NCHW inputs, same shape)."""
    assert output.shape == target.shape, "'input' and 'target' must have the same shape"
    N, C, H, W = output.shape
    HW = H * W

    # Free reshapes (no transpose, no extra HBM traffic): (N, C, H, W) -> (N, C, H*W).
    out3 = output.reshape(N, C, HW)
    tgt3 = target.reshape(N, C, HW)

    itemsize = max(jnp.dtype(output.dtype).itemsize, jnp.dtype(target.dtype).itemsize)
    tile_hw, grid_j, ragged = _pick_tile(HW, C, itemsize, max_tile=max_tile)

    kernel = _make_dice_kernel(HW, tile_hw, ragged)

    inter_part, tsum_part = pl.pallas_call(
        kernel,
        out_shape=(
            jax.ShapeDtypeStruct((N, 1, tile_hw), jnp.float32),
            jax.ShapeDtypeStruct((N, 1, tile_hw), jnp.float32),
        ),
        grid_spec=pltpu.PrefetchScalarGridSpec(
            num_scalar_prefetch=0,
            grid=(N, grid_j),
            in_specs=[
                pl.BlockSpec((1, C, tile_hw), lambda n, j: (n, 0, j)),
                pl.BlockSpec((1, C, tile_hw), lambda n, j: (n, 0, j)),
            ],
            out_specs=[
                pl.BlockSpec((1, 1, tile_hw), lambda n, j: (n, 0, 0)),
                pl.BlockSpec((1, 1, tile_hw), lambda n, j: (n, 0, 0)),
            ],
        ),
        compiler_params=pltpu.CompilerParams(
            dimension_semantics=("parallel", "arbitrary")),
    )(out3, tgt3)

    eps = jnp.float32(1e-5)
    intersect = jnp.sum(inter_part, dtype=jnp.float32) + eps
    # sum_c softmax(x)_c == 1 per pixel, so sum(p) == N*H*W; only sum(t) was accumulated.
    denominator = jnp.float32(N * HW) + jnp.sum(tsum_part, dtype=jnp.float32) + eps
    return 1.0 - intersect / denominator


if __name__ == "__main__":
    key = jax.random.PRNGKey(0)
    k1, k2 = jax.random.split(key)

    N, C, H, W = 2, 4, 16, 16
    logits = jax.random.normal(k1, (N, C, H, W), dtype=jnp.float32)
    # target has the same shape as output (soft per-pixel class probabilities)
    target = jax.nn.softmax(
        jax.random.normal(k2, (N, C, H, W), dtype=jnp.float32), axis=1)

    loss = dice_loss(logits, target)
    jax.block_until_ready(loss)

    # plain-JAX reference (mirrors the PyTorch forward exactly)
    p_ref = jax.nn.softmax(logits, axis=1)
    intersect = jnp.sum(p_ref * target) + 1e-5
    denominator = jnp.sum(p_ref + target) + 1e-5
    ref = 1.0 - intersect / denominator
    assert jnp.allclose(loss, ref, atol=1e-5, rtol=1e-5), (loss, ref)

    print("KERNEL_OK")
</pallas_src>

<mosaic_0001>
module attributes {stable_mosaic.version = 11 : i64} {
  func.func @kernel(%arg0: i32, %arg1: i32, %arg2: memref<1x4x256xf32, #tpu.memory_space<vmem>>, %arg3: memref<1x4x256xf32, #tpu.memory_space<vmem>>, %arg4: memref<1x1x256xf32, #tpu.memory_space<vmem>>, %arg5: memref<1x1x256xf32, #tpu.memory_space<vmem>>) attributes {dimension_semantics = [#tpu.dimension_semantics<parallel>, #tpu.dimension_semantics<arbitrary>], iteration_bounds = array<i64: 2, 1>, scalar_prefetch = 0 : i64, scratch_operands = 0 : i64, tpu.core_type = #tpu.core_type<tc>, window_params = [{transform_indices = @transform_0, window_bounds = array<i64: 1, 4, 256>}, {transform_indices = @transform_1, window_bounds = array<i64: 1, 4, 256>}, {transform_indices = @transform_2, window_bounds = array<i64: 1, 1, 256>}, {transform_indices = @transform_3, window_bounds = array<i64: 1, 1, 256>}]} {
    %c0_i32 = arith.constant 0 : i32
    %0 = arith.cmpi eq, %arg1, %c0_i32 : i32
    %1 = arith.extui %0 : i1 to i32
    %c0_i32_0 = arith.constant 0 : i32
    %2 = arith.cmpi ne, %1, %c0_i32_0 : i32
    scf.if %2 {
      %cst_21 = arith.constant 0.000000e+00 : f32
      %28 = vector.broadcast %cst_21 : f32 to vector<1x1x256xf32>
      %c0_22 = arith.constant 0 : index
      %c0_23 = arith.constant 0 : index
      %c0_24 = arith.constant 0 : index
      %29 = vector.load %arg4[%c0_22, %c0_23, %c0_24] : memref<1x1x256xf32, #tpu.memory_space<vmem>>, vector<1x1x256xf32>
      tpu.vector_store %arg4[%c0_22, %c0_23, %c0_24], %28 {strides = array<i32>} : memref<1x1x256xf32, #tpu.memory_space<vmem>>, vector<1x1x256xf32>,
      %cst_25 = arith.constant 0.000000e+00 : f32
      %30 = vector.broadcast %cst_25 : f32 to vector<1x1x256xf32>
      %c0_26 = arith.constant 0 : index
      %c0_27 = arith.constant 0 : index
      %c0_28 = arith.constant 0 : index
      %31 = vector.load %arg5[%c0_26, %c0_27, %c0_28] : memref<1x1x256xf32, #tpu.memory_space<vmem>>, vector<1x1x256xf32>
      tpu.vector_store %arg5[%c0_26, %c0_27, %c0_28], %30 {strides = array<i32>} : memref<1x1x256xf32, #tpu.memory_space<vmem>>, vector<1x1x256xf32>,
    } else {
    }
    %c0 = arith.constant 0 : index
    %c0_1 = arith.constant 0 : index
    %c0_2 = arith.constant 0 : index
    %3 = vector.load %arg2[%c0, %c0_1, %c0_2] : memref<1x4x256xf32, #tpu.memory_space<vmem>>, vector<1x4x256xf32>
    %4 = vector.shape_cast %3 : vector<1x4x256xf32> to vector<4x256xf32>
    %c0_3 = arith.constant 0 : index
    %c0_4 = arith.constant 0 : index
    %c0_5 = arith.constant 0 : index
    %5 = vector.load %arg3[%c0_3, %c0_4, %c0_5] : memref<1x4x256xf32, #tpu.memory_space<vmem>>, vector<1x4x256xf32>
    %6 = vector.shape_cast %5 : vector<1x4x256xf32> to vector<4x256xf32>
    %cst = arith.constant dense<0xFF800000> : vector<256xf32>
    %7 = vector.multi_reduction <maximumf>, %4, %cst [0] : vector<4x256xf32> to vector<256xf32>
    %8 = vector.shape_cast %7 : vector<256xf32> to vector<1x256xf32>
    %9 = vector.broadcast %8 : vector<1x256xf32> to vector<4x256xf32>
    %10 = arith.subf %4, %9 : vector<4x256xf32>
    %11 = math.exp %10 : vector<4x256xf32>
    %cst_6 = arith.constant dense<0.000000e+00> : vector<256xf32>
    %12 = vector.multi_reduction <add>, %11, %cst_6 [0] : vector<4x256xf32> to vector<256xf32>
    %13 = vector.shape_cast %12 : vector<256xf32> to vector<1x256xf32>
    %14 = arith.mulf %11, %6 : vector<4x256xf32>
    %cst_7 = arith.constant dense<0.000000e+00> : vector<256xf32>
    %15 = vector.multi_reduction <add>, %14, %cst_7 [0] : vector<4x256xf32> to vector<256xf32>
    %16 = vector.shape_cast %15 : vector<256xf32> to vector<1x256xf32>
    %c0_8 = arith.constant 0 : index
    %c0_9 = arith.constant 0 : index
    %c0_10 = arith.constant 0 : index
    %17 = vector.load %arg4[%c0_8, %c0_9, %c0_10] : memref<1x1x256xf32, #tpu.memory_space<vmem>>, vector<1x1x256xf32>
    %18 = arith.divf %16, %13 : vector<1x256xf32>
    %19 = vector.shape_cast %18 : vector<1x256xf32> to vector<1x1x256xf32>
    %20 = arith.addf %17, %19 : vector<1x1x256xf32>
    %c0_11 = arith.constant 0 : index
    %c0_12 = arith.constant 0 : index
    %c0_13 = arith.constant 0 : index
    %21 = vector.load %arg4[%c0_11, %c0_12, %c0_13] : memref<1x1x256xf32, #tpu.memory_space<vmem>>, vector<1x1x256xf32>
    tpu.vector_store %arg4[%c0_11, %c0_12, %c0_13], %20 {strides = array<i32>} : memref<1x1x256xf32, #tpu.memory_space<vmem>>, vector<1x1x256xf32>,
    %c0_14 = arith.constant 0 : index
    %c0_15 = arith.constant 0 : index
    %c0_16 = arith.constant 0 : index
    %22 = vector.load %arg5[%c0_14, %c0_15, %c0_16] : memref<1x1x256xf32, #tpu.memory_space<vmem>>, vector<1x1x256xf32>
    %cst_17 = arith.constant dense<0.000000e+00> : vector<256xf32>
    %23 = vector.multi_reduction <add>, %6, %cst_17 [0] : vector<4x256xf32> to vector<256xf32>
    %24 = vector.shape_cast %23 : vector<256xf32> to vector<1x256xf32>
    %25 = vector.shape_cast %24 : vector<1x256xf32> to vector<1x1x256xf32>
    %26 = arith.addf %22, %25 : vector<1x1x256xf32>
    %c0_18 = arith.constant 0 : index
    %c0_19 = arith.constant 0 : index
    %c0_20 = arith.constant 0 : index
    %27 = vector.load %arg5[%c0_18, %c0_19, %c0_20] : memref<1x1x256xf32, #tpu.memory_space<vmem>>, vector<1x1x256xf32>
    tpu.vector_store %arg5[%c0_18, %c0_19, %c0_20], %26 {strides = array<i32>} : memref<1x1x256xf32, #tpu.memory_space<vmem>>, vector<1x1x256xf32>,
    return
  }
  func.func @transform_0(%arg0: i32, %arg1: i32) -> (i32, i32, i32) {
    %c0_i32 = arith.constant 0 : i32
    %c0_i32_0 = arith.constant 0 : i32
    return %arg0, %c0_i32, %arg1 : i32, i32, i32
  }
  func.func @transform_1(%arg0: i32, %arg1: i32) -> (i32, i32, i32) {
    %c0_i32 = arith.constant 0 : i32
    %c0_i32_0 = arith.constant 0 : i32
    return %arg0, %c0_i32, %arg1 : i32, i32, i32
  }
  func.func @transform_2(%arg0: i32, %arg1: i32) -> (i32, i32, i32) {
    %c0_i32 = arith.constant 0 : i32
    %c0_i32_0 = arith.constant 0 : i32
    %c0_i32_1 = arith.constant 0 : i32
    return %arg0, %c0_i32, %c0_i32_0 : i32, i32, i32
  }
  func.func @transform_3(%arg0: i32, %arg1: i32) -> (i32, i32, i32) {
    %c0_i32 = arith.constant 0 : i32
    %c0_i32_0 = arith.constant 0 : i32
    %c0_i32_1 = arith.constant 0 : i32
    return %arg0, %c0_i32, %c0_i32_0 : i32, i32, i32
  }
}

</mosaic_0001>

<bundles_post_ra>
// kernel: tpu_custom_call.1
= control target key start
LH: loop header
LB: loop body
LE: loop exit
PB: predicated region body
PF: predicated region fallthrough
CT: control target
= control target key end

     0   :  { %9 = vsyncpa [#allocation3], 0  ;;  %s1182_s0 = inlined_call_operand.hbm [shape: f32[2,4,256], index: 0, kind: input, shape index: {}]   ;;  %s1183_s1 = inlined_call_operand.hbm [shape: f32[2,4,256], index: 1, kind: input, shape index: {}]   ;;  %s1184_s2 = inlined_call_operand.hbm [shape: f32[2,1,256], index: 2, kind: output, shape index: {0}]   ;;  %s1185_s3 = inlined_call_operand.hbm [shape: f32[2,1,256], index: 3, kind: output, shape index: {1}]  }
   0x1   :  { %11 = vsyncpa [#allocation3 + $0x1], 0 }
   0x2   :  { %12 = vsyncpa [#allocation6], 0 }
   0x3   :  { %14 = vsyncpa [#allocation6 + $0x1], 0 }
   0x4   :  { %15 = vsyncpa [#allocation4], 0 }
   0x5   :  { %17 = vsyncpa [#allocation4 + $0x1], 0 }
   0x6   :  { %18 = vsyncpa [#allocation9], 0 }
   0x7   :  { %20 = vsyncpa [#allocation9 + $0x1], 0  ;;  %s884_s12 = smov 0   ;;  %s886_s13 = smov 0  }
   0x8   :  { %s888_s14 = smov 0   ;;  %s890_s15 = smov 0  }
   0x9   :  { %s892_s16 = smov 0   ;;  %s894_s17 = smov 0  }
   0xa LB: > { %s570_s18 = sadd.s32 4294967295, %s856_s17   ;;  %s571_s19 = sadd.s32 4294967294, %s856_s17   ;;  %s856_s17 = sphi %s894_s17, %s26_s17   ;;  %s852_s16 = sphi %s892_s16, %s1207_s16   ;;  %s848_s15 = sphi %s890_s15, %s1206_s15   ;;  %s844_s14 = sphi %s888_s14, %s1205_s14   ;;  %s840_s13 = sphi %s886_s13, %s1204_s13   ;;  %s836_s12 = sphi %s884_s12, %s1203_s12  }
   0xb   : > { %s38_s20 = sadd.s32 1, %s852_s16  ;;  %s47_s21 = sadd.s32 1, %s844_s14 }
   0xc   : > { %p40_p0 = scmp.ge.s32.totalorder %s38_s20, 2  ;;  %p54_p1 = scmp.ne.s32.totalorder %s844_s14, %s840_s13 }
   0xd   : > { %p55_p2 = scmp.eq.s32.totalorder %s856_s17, 0  ;;  %p60_p3 = scmp.ne.s32.totalorder %s840_s13, %s836_s12 }
   0xe   : > { %s1209_s20 = smov (%p40_p0, %s38_s20), 0  ;;  %p61_p5 = scmp.eq.s32.totalorder %s570_s18, 0 }
   0xf   : > { %p925_p4 = por %p55_p2, %p54_p1  ;;  %s42_s23 = ssub.s32 %s852_s16, %s1209_s20 }
  0x10   : > { %p112_p6 = scmp.eq.s32.totalorder %s570_s18, 1  ;;  %p45_p7 = scmp.eq.s32.totalorder %s42_s23, 0 }
  0x11   : > { %p931_p8 = por %p61_p5, %p60_p3  ;;  %p118_p10 = scmp.eq.s32.totalorder %s571_s19, 1 }
  0x12   : > { %p935_p9 = por %p112_p6, %p54_p1  ;;  %p619_p13 = scmp.lt.s32.totalorder %s856_s17, 2 }
  0x13   : > { %s1189_s24 = scalar_select %p931_p8, 1, 0 }
  0x14   : > { %s1190_s25 = scalar_select %p935_p9, 1, 0 }
  0x15   : > { %s940_s26 = scalar_select %p45_p7, %s844_s14, %s47_s21  }
  0x16   : > { %p942_p11 = por %p118_p10, %p60_p3  ;;  %s949_s28 = sand.u32 1, %s844_s14  }
  0x17   : > { %s574_s29 = sshll.u32 %s949_s28, 3  ;;  %s593_s30 = sshll.u32 %s852_s16, 7 }
  0x18   : > { %s1191_s27 = scalar_select %p942_p11, 1, 0 }
  0x19   : > { %s958_s6 = scalar_lea.hbm %s1182_s0, %s593_s30  ;;  %s168_s7 = scalar_lea.vmem [#allocation2], %s574_s29 }
  0x1a   : > { %s178_s8 = sshll.u32 %s168_s7, 4  ;;  %p966_p0 = pnand %p619_p13, %p925_p4  ;;  %s962_s8 = int_to_ptr.vmem [resolvable:$true] %s178_s8 }
  0x1b   : > { %s165_s10 = scalar_lea.sflag [#allocation3], %s949_s28  ;;  %s678_s11 = scalar_lea.hbm %s958_s6, 128 }
  0x1c   : > { %p679_p3 = scmp.ne.s32.totalorder %s958_s6, %s678_s11  ;;  %p680_p5 = pneg %p966_p0 }
  0x1d   : > { %s683_s21 = scalar_lea.hbm %s1182_s0, 256  ;;  %p684_p4 = scmp.lt.u32.totalorder %s958_s6, %s1182_s0 }
  0x1e   : > { %p681_p6 = pnand %p680_p5, %p679_p3  ;;  %p685_p10 = scmp.lt.u32.totalorder %s683_s21, %s678_s11 }
  0x1f   : > { %p687_p12 = scmp.lt.u32.totalorder %s678_s11, %s958_s6 }
  0x20   : > { %p682_p7 = pneg %p681_p6  ;;  %p686_p13 = por %p685_p10, %p684_p4 }
  0x22   : > { %p688_p1 = por %p687_p12, %p686_p13 }
  0x24   : > { %p689_p2 = pnand %p688_p1, %p682_p7 }
  0x26   : > { %692 = shalt.err (!%p689_p2)
}
  0x27   : > { %s693_s4 = scalar_lea.vmem %s962_s8, 128  ;;  %s858_s5 = smov [#allocation2]  }
  0x28   : > { %p694_p3 = scmp.ne.s32.totalorder %s962_s8, %s693_s4  ;;  %s698_s7 = sshll.u32 %s858_s5, 4  ;;  %s699_s7 = int_to_ptr.vmem [resolvable:$false] %s698_s7 }
  0x29   : > { %s700_s18 = scalar_lea.vmem %s699_s7, 256  ;;  %p701_p9 = scmp.lt.s32.totalorder %s962_s8, %s699_s7 }
  0x2a   : > { %p696_p6 = pnand %p694_p3, %p680_p5  ;;  %p702_p4 = scmp.lt.s32.totalorder %s700_s18, %s693_s4 }
  0x2c   : > { %p697_p11 = pneg %p696_p6  ;;  %p703_p10 = por %p702_p4, %p701_p9 }
  0x2e   : > { %p704_p12 = pnand %p703_p10, %p697_p11 }
  0x30   : > { %707 = shalt.err (!%p704_p12)
}
  0x31   : > { %608 = dma.hbm_to_vmem [thread:$0]  (!%p966_p0), %s958_s6, 128, %s962_s8, %s165_s10  }
  0x32   : > { %p1193_p1 = scmp.lt.s32.totalorder %s856_s17, 3  ;;  %p1194_p2 = scmp.ge.s32.totalorder %s856_s17, 1 }
  0x33   : > { %s1011_s22 = scalar_lea.hbm %s1183_s1, %s593_s30  ;;  %s189_s23 = scalar_lea.vmem [#allocation5], %s574_s29 }
  0x34   : > { %p1002_p7 = pnand %p1194_p2, %p1193_p1  ;;  %s199_s4 = sshll.u32 %s189_s23, 4  ;;  %s200_s4 = int_to_ptr.vmem [resolvable:$true] %s199_s4 }
  0x35   : > { %s186_s6 = scalar_lea.sflag [#allocation6], %s949_s28  ;;  %s708_s8 = scalar_lea.hbm %s1011_s22, 128 }
  0x36   : > { %s1195_s11 = scalar_select %p1002_p7, 1, 0 }
  0x37   : > { %p709_p9 = scmp.ne.s32.totalorder %s1011_s22, %s708_s8  ;;  %s713_s30 = scalar_lea.hbm %s1183_s1, 256 }
  0x38   : > { %p714_p3 = scmp.lt.u32.totalorder %s1011_s22, %s1183_s1  ;;  %p715_p6 = scmp.lt.u32.totalorder %s713_s30, %s708_s8 }
  0x39   : > { %p711_p11 = pnand %p709_p9, %p680_p5  ;;  %p717_p10 = scmp.lt.u32.totalorder %s708_s8, %s1011_s22 }
  0x3a   : > { %p716_p4 = por %p715_p6, %p714_p3 }
  0x3b   : > { %p712_p13 = pneg %p711_p11 }
  0x3c   : > { %p718_p12 = por %p717_p10, %p716_p4 }
  0x3e   : > { %p719_p1 = pnand %p718_p12, %p712_p13 }
  0x40   : > { %722 = shalt.err (!%p719_p1)
}
  0x41   : > { %s723_s28 = scalar_lea.vmem %s200_s4, 128  ;;  %s859_s29 = smov [#allocation5]  }
  0x42   : > { %p724_p2 = scmp.ne.s32.totalorder %s200_s4, %s723_s28  ;;  %s728_s19 = sshll.u32 %s859_s29, 4  ;;  %s729_s19 = int_to_ptr.vmem [resolvable:$false] %s728_s19 }
  0x43   : > { %s730_s21 = scalar_lea.vmem %s729_s19, 256  ;;  %p731_p8 = scmp.lt.s32.totalorder %s200_s4, %s729_s19 }
  0x44   : > { %p726_p9 = pnand %p724_p2, %p680_p5  ;;  %p732_p7 = scmp.lt.s32.totalorder %s730_s21, %s723_s28 }
  0x46   : > { %p727_p11 = pneg %p726_p9  ;;  %p733_p3 = por %p732_p7, %p731_p8 }
  0x48   : > { %p734_p6 = pnand %p733_p3, %p727_p11 }
  0x4a   : > { %737 = shalt.err (!%p734_p6)
}
  0x4b   : > { %611 = dma.hbm_to_vmem [thread:$0]  (!%p966_p0), %s1011_s22, 128, %s200_s4, %s186_s6  }
  0x4c   : > { %p1196_p13 = scmp.ne.s32.totalorder %s1195_s11, 0 }
  0x4d   : > { %s1038_s23 = sand.u32 (!%p1196_p13), 1, %s840_s13   ;;  %p1197_p5 = scmp.ne.s32.totalorder (!%p1196_p13), %s1189_s24, 0 }
  0x4e   : > { %208 = sbr.rel (%p1196_p13) target bundleno = 176 (0xb0), region = 28  ;;  %s581_s8 = sshll.u32 (!%p1196_p13), %s1038_s23, 3 }
  0x4f   : > { %s211_s10 = scalar_lea.sflag (!%p1196_p13), [#allocation3], %s1038_s23  ;;  %s214_s5 = scalar_lea.vmem (!%p1196_p13), [#allocation2], %s581_s8 }
  0x55   : > { %819 = dma.done.wait (%p1197_p5), %s211_s10, 128  }
  0x56   : > { %821 = vsyncadd (%p1197_p5), %s211_s10, 4294967168  ;;  %s220_s9 = scalar_lea.sflag [#allocation6], %s1038_s23  ;;  %s223_s22 = scalar_lea.vmem [#allocation5], %s581_s8 }
  0x57   : > { %823 = dma.done.wait (%p1197_p5), %s220_s9, 128  }
  0x58   : > { %825 = vsyncadd (%p1197_p5), %s220_s9, 4294967168  ;;  %s583_s11 = sshll.u32 %s1038_s23, 1  ;;  %v262_v0 = vlaneseq  ;;  %v860_v2 = vmov 0.0   ;;  %vm273_vm1 = vcmask 1043456   ;;  %v268_v3 = vld [vmem:[%s214_s5] sm:$0xff]  ;;  %v1066_v4 = vld [vmem:[%s223_s22] sm:$0xff] }
  0x59   : > { %s1056_s4 = scalar_lea.vmem [#allocation7], %s583_s11  ;;  %s1061_s6 = scalar_lea.vmem [#allocation8], %s583_s11  ;;  %v271_v5 = vcombine.high %v268_v3, %v268_v3  ;;  %v274_v6 = vsel %vm273_vm1, %v268_v3, -inf  ;;  %v361_v7 = vcombine.high %v1066_v4, %v1066_v4  ;;  %v363_v8 = vsel %vm273_vm1, %v1066_v4, 0.0 }
  0x5a   : > { %vm1052_vm0 = vcmp.lt.s32.totalorder %v262_v0, 256  ;;  %v275_v9 = vrot.slane %v274_v6, 4  ;;  %v364_v10 = vrot.slane %v363_v8, 4  ;;  %v861_v17 = vmov 1966171168   ;;  %s595_s24 = sshll.u32 %s848_s15, 5 }
  0x5b   : > { %266 = vst.msk [vmem:[%s1056_s4] sm:$0x3] %vm1052_vm0, %v860_v2  ;;  %267 = vst.msk [vmem:[%s1061_s6] sm:$0x3] %vm1052_vm0, %v860_v2  ;;  %v281_v11 = vsel %vm273_vm1, %v271_v5, -inf  ;;  %v370_v12 = vsel %vm273_vm1, %v361_v7, 0.0  ;;  %v339_v18 = vunpack.c.l.s4 %v861_v17  ;;  %s1087_s28 = scalar_lea.hbm %s1185_s3, %s595_s24 }
  0x5c   : > { %v276_v13 = vmax.f32 %v274_v6, %v275_v9  ;;  %v282_v14 = vrot.slane %v281_v11, 4  ;;  %v365_v15 = vadd.f32 %v364_v10, %v363_v8  ;;  %v371_v16 = vrot.slane %v370_v12, 4  ;;  %s431_s30 = sshll.u32 %s1061_s6, 4  ;;  %s403_s29 = scalar_lea.sflag [#allocation9], %s1038_s23  ;;  %s1089_s30 = int_to_ptr.vmem [resolvable:$true] %s431_s30 }
  0x5d   : > { %v340_v27 = vunpack.c.0.s8 %v339_v18  ;;  %v342_v28 = vshrl.u32 %v262_v0, 7  ;;  %s738_s19 = scalar_lea.vmem %s1089_s30, 32  ;;  %p1200_p0 = scmp.ne.s32.totalorder %s1190_s25, 0 }
  0x5e   : > { %v277_v19 = vrot.slane %v276_v13, 2  ;;  %v283_v20 = vmax.f32 %v281_v11, %v282_v14  ;;  %v366_v21 = vrot.slane %v365_v15, 2  ;;  %v372_v22 = vadd.f32 %v371_v16, %v370_v12  ;;  %p739_p8 = scmp.ne.s32.totalorder %s1089_s30, %s738_s19  ;;  %s862_s21 = smov [#allocation8]  }
  0x5f   : > { %v1075_v38 = vsub.s32 %v340_v27, %v342_v28  ;;  %s742_s8 = sshll.u32 %s862_s21, 4  ;;  %s743_s8 = int_to_ptr.vmem [resolvable:$false] %s742_s8 }
  0x60   : > { %v278_v23 = vmax.f32 %v276_v13, %v277_v19  ;;  %v284_v24 = vrot.slane %v283_v20, 2  ;;  %v367_v25 = vadd.f32 %v366_v21, %v365_v15  ;;  %v373_v26 = vrot.slane %v372_v22, 2  ;;  %p740_p7 = pnand %p739_p8, %p1200_p0  ;;  %s744_s10 = scalar_lea.vmem %s743_s8, 64 }
  0x61   : > { %p745_p10 = scmp.lt.s32.totalorder %s1089_s30, %s743_s8  ;;  %p746_p12 = scmp.lt.s32.totalorder %s744_s10, %s738_s19 }
  0x62   : > { %v279_v29 = vrot.slane %v278_v23, 1  ;;  %v285_v30 = vmax.f32 %v283_v20, %v284_v24  ;;  %v368_v31 = vrot.slane %v367_v25, 1  ;;  %v374_v32 = vadd.f32 %v373_v26, %v372_v22  ;;  %v359_v44 = vld [vmem:[%s1061_s6] sm:$0x3]  ;;  %p741_p4 = pneg %p740_p7 }
  0x63   : > { %p747_p1 = por %p746_p12, %p745_p10 }
  0x64   : > { %v280_v33 = vmax.f32 %v278_v23, %v279_v29  ;;  %v286_v34 = vrot.slane %v285_v30, 1  ;;  %v369_v35 = vadd.f32 %v368_v31, %v367_v25  ;;  %v375_v36 = vrot.slane %v374_v32, 1 }
  0x65   : > { %p748_p2 = pnand %p747_p1, %p741_p4 }
  0x66   : > { %v287_v37 = vmax.f32 %v285_v30, %v286_v34  ;;  %v376_v39 = vadd.f32 %v375_v36, %v374_v32 }
  0x68   : > { %v290_v40 = vcombine.low %v280_v33, %v287_v37  ;;  %v379_v41 = vcombine.low %v369_v35, %v376_v39 }
  0x6a   : > { %v292_v42 = vsub.f32 %v268_v3, %v290_v40  ;;  %v386_v43 = vrot.slane %v379_v41, %v1075_v38 }
  0x6c   : > { %v293_v45 = vmul.f32 1.442695, %v292_v42  ;;  %v393_v46 = vrot.slane %v386_v43, %v1075_v38 }
  0x6e   : > { %672 = vpow2.f32 %v293_v45  ;;  %v395_v47 = vadd.f32 %v393_v46, %v359_v44 }
  0x70   : > { %396 = vst.msk [vmem:[%s1061_s6] sm:$0x3] %vm1052_vm0, %v395_v47 }
  0x71   : > { %751 = shalt.err (!%p748_p2)
}
  0x72   : > { %s752_s5 = scalar_lea.hbm %s1087_s28, 32  ;;  %s756_s11 = scalar_lea.hbm %s1185_s3, 64 }
  0x73   : > { %p753_p9 = scmp.ne.s32.totalorder %s1087_s28, %s752_s5  ;;  %p757_p6 = scmp.lt.u32.totalorder %s1087_s28, %s1185_s3 }
  0x74   : > { %p758_p13 = scmp.lt.u32.totalorder %s756_s11, %s752_s5  ;;  %p760_p8 = scmp.lt.u32.totalorder %s752_s5, %s1087_s28 }
  0x75   : > { %p754_p11 = pnand %p753_p9, %p1200_p0 }
  0x76   : > { %p759_p5 = por %p758_p13, %p757_p6 }
  0x77   : > { %p755_p3 = pneg %p754_p11 }
  0x78   : > { %p761_p7 = por %p760_p8, %p759_p5 }
  0x7a   : > { %p762_p4 = pnand %p761_p7, %p755_p3 }
  0x7c   : > { %765 = shalt.err (!%p762_p4)
}
  0x7d   : > { %602 = dma.vmem_to_hbm [thread:$0]  (%p1200_p0), %s1089_s30, 32, %s1087_s28, %s403_s29   ;;  %v673_v48 = vpop.eup %672  ;;  %v330_v23 = vld [vmem:[%s1056_s4] sm:$0x3] }
  0x7e   : > { %v296_v49 = vcombine.high %v673_v48, %v673_v48  ;;  %v298_v50 = vsel %vm273_vm1, %v673_v48, 0.0  ;;  %v312_v51 = vmul.f32 %v673_v48, %v1066_v4  ;;  %s417_s30 = sshll.u32 %s1056_s4, 4  ;;  %s1130_s29 = scalar_lea.hbm %s1184_s2, %s595_s24  ;;  %s1132_s30 = int_to_ptr.vmem [resolvable:$true] %s417_s30 }
  0x7f   : > { %v299_v52 = vrot.slane %v298_v50, 4  ;;  %s398_s19 = scalar_lea.sflag [#allocation4], %s1038_s23  ;;  %s766_s21 = scalar_lea.vmem %s1132_s30, 32 }
  0x80   : > { %v305_v53 = vsel %vm273_vm1, %v296_v49, 0.0  ;;  %v314_v54 = vcombine.high %v312_v51, %v312_v51  ;;  %v316_v55 = vsel %vm273_vm1, %v312_v51, 0.0  ;;  %p767_p10 = scmp.ne.s32.totalorder %s1132_s30, %s766_s21  ;;  %s863_s15 = smov [#allocation7]  }
  0x81   : > { %v300_v56 = vadd.f32 %v299_v52, %v298_v50  ;;  %v306_v57 = vrot.slane %v305_v53, 4  ;;  %v317_v58 = vrot.slane %v316_v55, 4  ;;  %s770_s8 = sshll.u32 %s863_s15, 4  ;;  %s771_s8 = int_to_ptr.vmem [resolvable:$false] %s770_s8 }
  0x82   : > { %v323_v59 = vsel %vm273_vm1, %v314_v54, 0.0  ;;  %p768_p12 = pnand %p767_p10, %p1200_p0  ;;  %s772_s10 = scalar_lea.vmem %s771_s8, 64 }
  0x83   : > { %v301_v60 = vrot.slane %v300_v56, 2  ;;  %v307_v61 = vadd.f32 %v306_v57, %v305_v53  ;;  %v318_v62 = vadd.f32 %v317_v58, %v316_v55  ;;  %v324_v63 = vrot.slane %v323_v59, 4  ;;  %p773_p2 = scmp.lt.s32.totalorder %s1132_s30, %s771_s8  ;;  %p774_p9 = scmp.lt.s32.totalorder %s772_s10, %s766_s21 }
  0x84   : > { %p769_p1 = pneg %p768_p12 }
  0x85   : > { %v302_v0 = vadd.f32 %v301_v60, %v300_v56  ;;  %v308_v2 = vrot.slane %v307_v61, 2  ;;  %v325_v3 = vadd.f32 %v324_v63, %v323_v59  ;;  %v319_v5 = vrot.slane %v318_v62, 2  ;;  %p775_p11 = por %p774_p9, %p773_p2 }
  0x87   : > { %v303_v4 = vrot.slane %v302_v0, 1  ;;  %v309_v6 = vadd.f32 %v308_v2, %v307_v61  ;;  %v326_v7 = vrot.slane %v325_v3, 2  ;;  %v320_v10 = vadd.f32 %v319_v5, %v318_v62  ;;  %p776_p3 = pnand %p775_p11, %p769_p1 }
  0x89   : > { %v304_v8 = vadd.f32 %v303_v4, %v302_v0  ;;  %v310_v9 = vrot.slane %v309_v6, 1  ;;  %v327_v12 = vadd.f32 %v326_v7, %v325_v3  ;;  %v321_v13 = vrot.slane %v320_v10, 1 }
  0x8b   : > { %v311_v11 = vadd.f32 %v310_v9, %v309_v6  ;;  %674 = vrcp.f32 %v304_v8  ;;  %v328_v14 = vrot.slane %v327_v12, 1  ;;  %v322_v15 = vadd.f32 %v321_v13, %v320_v10 }
  0x8d   : > { %676 = vrcp.f32 %v311_v11  ;;  %v329_v16 = vadd.f32 %v328_v14, %v327_v12 }
  0x95   : > { %v675_v17 = vpop.eup %674 }
  0x96   : > { %v332_v18 = vmul.f32 %v675_v17, %v322_v15 }
  0x97   : > { %v677_v19 = vpop.eup %676 }
  0x98   : > { %v334_v20 = vmul.f32 %v677_v19, %v329_v16 }
  0x9a   : > { %v337_v21 = vcombine.low %v332_v18, %v334_v20 }
  0x9c   : > { %v344_v22 = vrot.slane %v337_v21, %v1075_v38 }
  0x9e   : > { %v351_v24 = vrot.slane %v344_v22, %v1075_v38 }
  0xa0   : > { %v353_v25 = vadd.f32 %v351_v24, %v330_v23 }
  0xa2   : > { %358 = vst.msk [vmem:[%s1056_s4] sm:$0x3] %vm1052_vm0, %v353_v25 }
  0xa3   : > { %779 = shalt.err (!%p776_p3)
}
  0xa4   : > { %s780_s23 = scalar_lea.hbm %s1130_s29, 32  ;;  %s784_s5 = scalar_lea.hbm %s1184_s2, 64 }
  0xa5   : > { %p781_p6 = scmp.ne.s32.totalorder %s1130_s29, %s780_s23  ;;  %p785_p8 = scmp.lt.u32.totalorder %s1130_s29, %s1184_s2 }
  0xa6   : > { %p786_p7 = scmp.lt.u32.totalorder %s784_s5, %s780_s23  ;;  %p788_p10 = scmp.lt.u32.totalorder %s780_s23, %s1130_s29 }
  0xa7   : > { %p782_p13 = pnand %p781_p6, %p1200_p0 }
  0xa8   : > { %p787_p4 = por %p786_p7, %p785_p8 }
  0xa9   : > { %p783_p5 = pneg %p782_p13 }
  0xaa   : > { %p789_p12 = por %p788_p10, %p787_p4 }
  0xac   : > { %p790_p1 = pnand %p789_p12, %p783_p5 }
  0xae   : > { %793 = shalt.err (!%p790_p1)
}
  0xaf   : > { %601 = dma.vmem_to_hbm [thread:$0]  (%p1200_p0), %s1132_s30, 32, %s1130_s29, %s398_s19  }
  0xb0 PF: > { %s443_s11 = sand.u32 1, %s836_s12   ;;  %p1201_p2 = scmp.ne.s32.totalorder %s1191_s27, 0 }
  0xb1   : > { %p1202_p9 = scmp.ge.s32.totalorder %s856_s17, 2  ;;  %s444_s6 = scalar_lea.sflag [#allocation4], %s443_s11 }
  0xb3   : > { %p613_p11 = pnand %p1202_p9, %p1201_p2 }
  0xb5   : > { %827 = dma.done.wait (!%p613_p11), %s444_s6, 32  }
  0xb6   : > { %829 = vsyncadd (!%p613_p11), %s444_s6, 4294967264  ;;  %s453_s7 = scalar_lea.sflag [#allocation9], %s443_s11 }
  0xb7   : > { %831 = dma.done.wait (!%p613_p11), %s453_s7, 32  }
  0xb8   : > { %833 = vsyncadd (!%p613_p11), %s453_s7, 4294967264  ;;  %s26_s17 = sadd.s32 1, %s856_s17   ;;  %s1203_s12 = smov %s840_s13 }
  0xb9   : > { %p23_p3 = scmp.ge.s32.totalorder %s26_s17, 4   ;;  %s1204_s13 = smov %s844_s14 }
  0xba   : > { %s1205_s14 = smov %s940_s26  ;;  %s1206_s15 = smov %s852_s16 }
  0xbb   : > { %s1207_s16 = smov %s1209_s20  ;;  %25 = sbr.rel (!%p23_p3) target bundleno = 10 (0xa), region = 107 }
  0xc2   :  { %458 = vsyncpa [#allocation3], 1 }
  0xc3   :  { %460 = vsyncpa [#allocation3 + $0x1], 1 }
  0xc4   :  { %461 = vsyncpa [#allocation6], 1 }
  0xc5   :  { %463 = vsyncpa [#allocation6 + $0x1], 1 }
  0xc6   :  { %464 = vsyncpa [#allocation4], 1 }
  0xc7   :  { %466 = vsyncpa [#allocation4 + $0x1], 1 }
  0xc8   :  { %467 = vsyncpa [#allocation9], 1 }
  0xc9   :  { %469 = vsyncpa [#allocation9 + $0x1], 1 }

</bundles_post_ra>
